<compile_context>
chip_gen: v7x
topology: tpu7x:2x2x1
jax: 0.10.0
libtpu: 0.0.40
codegen_flags: <defaults>
</compile_context>

<pallas_src>
import functools

import jax
import jax.numpy as jnp
from jax.experimental import pallas as pl
from jax.experimental.pallas import tpu as pltpu

D_IN = 2          # observation dim (D_in = 2 in the PyTorch script)
H1 = 128          # hidden width
N_ACTIONS = 6     # gym Pong-v0 action_space.n


def policy_kernel(xt_ref, w1_ref, w2_ref, ot_ref):
    # xt_ref: [D_IN, TB]        (VMEM)  -- batch on the lane axis
    # w1_ref: [H1, D_IN]        (VMEM)  -- PyTorch l1.weight layout [out, in]
    # w2_ref: [N_ACTIONS, H1]   (VMEM)  -- PyTorch l2.weight layout [out, in]
    # ot_ref: [N_ACTIONS, TB]   (VMEM)  -- lane-dense output tile
    xt = xt_ref[...]
    w1 = w1_ref[...]

    # ---- Linear 1 (no bias), K = D_IN = 2 on the VPU:
    #   h_T[h, b] = sum_i W1[h, i] * x_T[i, b]
    # W1 column splats are batch-invariant (computed once per tile); x_T rows
    # broadcast along sublanes (cheap). Statically unrolled (D_IN is constant).
    h = w1[:, 0:1] * xt[0:1, :]                     # [H1,1]*[1,TB] -> [H1,TB]
    for i in range(1, D_IN):
        h = h + w1[:, i:i + 1] * xt[i:i + 1, :]
    h = jnp.maximum(h, 0.0)                         # ReLU

    # ---- Linear 2 (no bias), K = 128 on the MXU: [6,128] @ [128,TB] -> [6,TB].
    logits = jnp.dot(w2_ref[...], h, preferred_element_type=jnp.float32)

    # ---- Softmax over the action (sublane) axis. Exact division so rows sum
    # to 1 within fp32 rounding (approx reciprocal broke the 1e-3-level check).
    m = jnp.max(logits, axis=0, keepdims=True)
    e = jnp.exp(logits - m)
    denom = jnp.sum(e, axis=0, keepdims=True)
    ot_ref[...] = (e / denom).astype(ot_ref.dtype)


@functools.partial(jax.jit, static_argnames=("tb",))
def policy_forward(x, w1, w2, tb=32768):
    """Forward pass matching the PyTorch module.

    x : [B, D_IN] f32
    w1: [H1, D_IN] f32         (PyTorch l1.weight, no transpose needed)
    w2: [N_ACTIONS, H1] f32    (PyTorch l2.weight, no transpose needed)
    returns [B, N_ACTIONS] softmax probabilities.
    """
    B = x.shape[0]
    # One-time layout flip: batch onto the lane axis (tiny [B,2] transpose).
    xt = jnp.transpose(x)                           # [D_IN, B]

    if B <= tb:
        # Small batch: single gridless invocation, everything resident in VMEM.
        # This path is launch/DMA-latency dominated; batch env steps or fuse
        # upstream if it is latency-critical (structural, not in-kernel, win).
        vmem = pl.BlockSpec(memory_space=pltpu.MemorySpace.VMEM)
        out_t = pl.pallas_call(
            policy_kernel,
            out_shape=jax.ShapeDtypeStruct((N_ACTIONS, B), jnp.float32),
            in_specs=[vmem, vmem, vmem],
            out_specs=vmem,
        )(xt, w1, w2)
        return jnp.transpose(out_t)                 # [B, N_ACTIONS]

    # Large batch: tile the batch (lane) dim. "parallel" lets Mosaic shard
    # batch tiles across TensorCores on v7x; big tb amortizes the ~0.35 us
    # per-grid-step overhead on v5e/v6e. tb must be a multiple of 128.
    assert tb % 128 == 0, "tb must be a multiple of 128 (lane-axis block)"
    out_t = pl.pallas_call(
        policy_kernel,
        out_shape=jax.ShapeDtypeStruct((N_ACTIONS, B), jnp.float32),
        grid_spec=pltpu.PrefetchScalarGridSpec(
            num_scalar_prefetch=0,
            grid=(pl.cdiv(B, tb),),
            in_specs=[
                pl.BlockSpec((D_IN, tb), lambda i: (0, i)),
                pl.BlockSpec((H1, D_IN), lambda i: (0, 0)),
                pl.BlockSpec((N_ACTIONS, H1), lambda i: (0, 0)),
            ],
            out_specs=pl.BlockSpec((N_ACTIONS, tb), lambda i: (0, i)),
        ),
        compiler_params=pltpu.CompilerParams(
            dimension_semantics=("parallel",)),
    )(xt, w1, w2)
    return jnp.transpose(out_t)                     # [B, N_ACTIONS]


def reference_forward(x, w1_pt, w2_pt):
    h = jnp.maximum(x @ w1_pt.T, 0.0)
    logits = h @ w2_pt.T
    return jax.nn.softmax(logits, axis=-1)


if __name__ == "__main__":
    key = jax.random.PRNGKey(0)
    kx, k1, k2, kx2 = jax.random.split(key, 4)

    # Deterministic synthetic parameters in PyTorch nn.Linear layout ([out, in]).
    bound1 = 1.0 / (D_IN ** 0.5)
    bound2 = 1.0 / (H1 ** 0.5)
    w1 = jax.random.uniform(k1, (H1, D_IN), dtype=jnp.float32,
                            minval=-bound1, maxval=bound1)
    w2 = jax.random.uniform(k2, (N_ACTIONS, H1), dtype=jnp.float32,
                            minval=-bound2, maxval=bound2)

    # --- small-batch (gridless) path, like the per-env-step use case.
    B = 8
    x = jax.random.normal(kx, (B, D_IN), dtype=jnp.float32)
    out = jax.block_until_ready(policy_forward(x, w1, w2))
    ref = reference_forward(x, w1, w2)
    assert out.shape == (B, N_ACTIONS)
    assert jnp.allclose(jnp.sum(out, axis=-1), 1.0, atol=1e-5)
    assert jnp.allclose(out, ref, atol=1e-4, rtol=1e-4)

    # --- batch-tiled ("parallel") path, exercised with a small tile (grid=2).
    B2, TB = 256, 128
    x2 = jax.random.normal(kx2, (B2, D_IN), dtype=jnp.float32)
    out2 = jax.block_until_ready(policy_forward(x2, w1, w2, tb=TB))
    ref2 = reference_forward(x2, w1, w2)
    assert out2.shape == (B2, N_ACTIONS)
    assert jnp.allclose(jnp.sum(out2, axis=-1), 1.0, atol=1e-5)
    assert jnp.allclose(out2, ref2, atol=1e-4, rtol=1e-4)

    print("KERNEL_OK")
</pallas_src>

<mosaic_0001>
module attributes {stable_mosaic.version = 11 : i64} {
  func.func @policy_kernel(%arg0: memref<2x8xf32, #tpu.memory_space<vmem>>, %arg1: memref<128x2xf32, #tpu.memory_space<vmem>>, %arg2: memref<6x128xf32, #tpu.memory_space<vmem>>, %arg3: memref<6x8xf32, #tpu.memory_space<vmem>>) attributes {dimension_semantics = [], scalar_prefetch = 0 : i64, scratch_operands = 0 : i64, tpu.core_type = #tpu.core_type<tc>} {
    %c0 = arith.constant 0 : index
    %c0_0 = arith.constant 0 : index
    %0 = vector.load %arg0[%c0, %c0_0] : memref<2x8xf32, #tpu.memory_space<vmem>>, vector<2x8xf32>
    %c0_1 = arith.constant 0 : index
    %c0_2 = arith.constant 0 : index
    %1 = vector.load %arg1[%c0_1, %c0_2] : memref<128x2xf32, #tpu.memory_space<vmem>>, vector<128x2xf32>
    %2 = vector.extract_strided_slice %1 {offsets = [0, 0], sizes = [128, 1], strides = [1, 1]} : vector<128x2xf32> to vector<128x1xf32>
    %3 = vector.extract_strided_slice %0 {offsets = [0, 0], sizes = [1, 8], strides = [1, 1]} : vector<2x8xf32> to vector<1x8xf32>
    %4 = vector.broadcast %2 : vector<128x1xf32> to vector<128x8xf32>
    %5 = vector.broadcast %3 : vector<1x8xf32> to vector<128x8xf32>
    %6 = arith.mulf %4, %5 : vector<128x8xf32>
    %7 = vector.extract_strided_slice %1 {offsets = [0, 1], sizes = [128, 1], strides = [1, 1]} : vector<128x2xf32> to vector<128x1xf32>
    %8 = vector.extract_strided_slice %0 {offsets = [1, 0], sizes = [1, 8], strides = [1, 1]} : vector<2x8xf32> to vector<1x8xf32>
    %9 = vector.broadcast %7 : vector<128x1xf32> to vector<128x8xf32>
    %10 = vector.broadcast %8 : vector<1x8xf32> to vector<128x8xf32>
    %11 = arith.mulf %9, %10 : vector<128x8xf32>
    %12 = arith.addf %6, %11 : vector<128x8xf32>
    %cst = arith.constant 0.000000e+00 : f32
    %13 = vector.broadcast %cst : f32 to vector<128x8xf32>
    %14 = arith.maximumf %12, %13 : vector<128x8xf32>
    %c0_3 = arith.constant 0 : index
    %c0_4 = arith.constant 0 : index
    %15 = vector.load %arg2[%c0_3, %c0_4] : memref<6x128xf32, #tpu.memory_space<vmem>>, vector<6x128xf32>
    %cst_5 = arith.constant dense<0.000000e+00> : vector<6x8xf32>
    %16 = tpu.matmul %15, %14, %cst_5 {dimension_numbers = #tpu.dot_dimension_numbers<[1], [0], [0], [1], [0, 0, 1, 1], [], []>} : vector<6x128xf32>, vector<128x8xf32>, vector<6x8xf32> -> vector<6x8xf32>
    %cst_6 = arith.constant dense<0xFF800000> : vector<8xf32>
    %17 = vector.multi_reduction <maximumf>, %16, %cst_6 [0] : vector<6x8xf32> to vector<8xf32>
    %18 = vector.shape_cast %17 : vector<8xf32> to vector<1x8xf32>
    %19 = vector.broadcast %18 : vector<1x8xf32> to vector<6x8xf32>
    %20 = arith.subf %16, %19 : vector<6x8xf32>
    %21 = math.exp %20 : vector<6x8xf32>
    %cst_7 = arith.constant dense<0.000000e+00> : vector<8xf32>
    %22 = vector.multi_reduction <add>, %21, %cst_7 [0] : vector<6x8xf32> to vector<8xf32>
    %23 = vector.shape_cast %22 : vector<8xf32> to vector<1x8xf32>
    %24 = vector.broadcast %23 : vector<1x8xf32> to vector<6x8xf32>
    %25 = arith.divf %21, %24 : vector<6x8xf32>
    %c0_8 = arith.constant 0 : index
    %c0_9 = arith.constant 0 : index
    %26 = vector.load %arg3[%c0_8, %c0_9] : memref<6x8xf32, #tpu.memory_space<vmem>>, vector<6x8xf32>
    tpu.vector_store %arg3[%c0_8, %c0_9], %25 {strides = array<i32>} : memref<6x8xf32, #tpu.memory_space<vmem>>, vector<6x8xf32>,
    return
  }
}

</mosaic_0001>

<bundles_post_ra>
// kernel: policy_forward.1
= control target key start
LH: loop header
LB: loop body
LE: loop exit
PB: predicated region body
PF: predicated region fallthrough
CT: control target
= control target key end

     0   :  { %v446_v0 = vmov 1   ;;  %v447_v7 = vmov 0   ;;  %v448_v10 = vmov 0.0|0.0   ;;  %vm449_vm0 = vmmov 0   ;;  %s588_s1 = inlined_call_operand.vmem [shape: f32[128,2], index: 1, kind: input, shape index: {}]   ;;  %s589_s0 = inlined_call_operand.vmem [shape: f32[2,8], index: 0, kind: input, shape index: {}]   ;;  %s590_s2 = inlined_call_operand.vmem [shape: f32[6,128], index: 2, kind: input, shape index: {}]   ;;  %s591_s3 = inlined_call_operand.vmem [shape: f32[6,8], index: 3, kind: output, shape index: {}]  }
   0x1   :  { %426 = vset.pattern.permute.xlu0 %v446_v0  ;;  %424 = vset.pattern.permute.xlu1 %v446_v0  ;;  %v17_v1 = vld [vmem:[%s588_s1 + $0x10] sm:$0xff]  ;;  %v15_v2 = vld [vmem:[%s588_s1] sm:$0xff]  ;;  %v16_v4 = vld [vmem:[%s588_s1 + $0x8] sm:$0xff]  ;;  %v450_v19 = vmov 0.0   ;;  %v111_v20 = vlaneseq  ;;  %vm318_vm1 = vcmask 62464  }
   0x2   :  { %140 = vperm.xlu0 %426, %v17_v1   ;;  %132 = vperm.xlu1 %424, %v15_v2   ;;  %v21_v3 = vld [vmem:[%s588_s1 + $0x30] sm:$0xff]  ;;  %v18_v6 = vld [vmem:[%s588_s1 + $0x18] sm:$0xff]  ;;  %v19_v8 = vld [vmem:[%s588_s1 + $0x20] sm:$0xff] }
   0x3   :  { %v25_v5 = vld [vmem:[%s588_s1 + $0x50] sm:$0xff]  ;;  %v20_v9 = vld [vmem:[%s588_s1 + $0x28] sm:$0xff]  ;;  %395 = vmatprep.subr.bf16.mxu0 %v448_v10  ;;  %v22_v12 = vld [vmem:[%s588_s1 + $0x38] sm:$0xff]  ;;  %392 = vmatprep.mubr.msk.f32.mxu0 %vm449_vm0, %v450_v19  ;;  %v112_v23 = vshrl.u32 %v111_v20, 7 }
   0x4   :  { %v24_v11 = vld [vmem:[%s588_s1 + $0x48] sm:$0xff]  ;;  %v23_v14 = vld [vmem:[%s588_s1 + $0x40] sm:$0xff]  ;;  %v29_v15 = vld [vmem:[%s588_s1 + $0x70] sm:$0xff] }
   0x5   :  { %v28_v13 = vld [vmem:[%s588_s1 + $0x68] sm:$0xff]  ;;  %v26_v16 = vld [vmem:[%s588_s1 + $0x58] sm:$0xff]  ;;  %v27_v17 = vld [vmem:[%s588_s1 + $0x60] sm:$0xff]  ;;  %v197_v26 = vsub.s32 1, %v112_v23  ;;  %v113_v28 = vsub.s32 0, %v112_v23 }
   0x6   :  { %156 = vperm.xlu0 %426, %v21_v3   ;;  %136 = vperm.xlu1 %424, %v16_v4   ;;  %v30_v18 = vld [vmem:[%s588_s1 + $0x78] sm:$0xff]  ;;  %v14_v29 = vld [vmem:[%s589_s0] sm:$0x3] }
   0x7   :  { %v535_v31 = vrot.slane %v14_v29, %v197_v26  ;;  %v537_v32 = vrot.slane %v14_v29, %v113_v28 }
   0xa   :  { %172 = vperm.xlu0 %426, %v25_v5   ;;  %425 = vset.pattern.permute.xlu1 %v447_v7 }
   0xb   :  { %48 = vperm.xlu1 %425, %v18_v6  }
   0xe   :  { %435 = vset.pattern.permute.xlu0 %v447_v7 }
   0xf   :  { %33 = vperm.xlu0 %435, %v15_v2   ;;  %427 = vset.pattern.permute.xlu1 %v446_v0 }
  0x10   :  { %144 = vperm.xlu1 %427, %v18_v6  }
  0x13   :  { %38 = vperm.xlu0 %435, %v16_v4  }
  0x14   :  { %428 = vset.pattern.permute.xlu1 %v447_v7 }
  0x15   :  { %53 = vperm.xlu1 %428, %v19_v8  }
  0x17   :  { %43 = vperm.xlu0 %435, %v17_v1  }
  0x19   :  { %429 = vset.pattern.permute.xlu1 %v446_v0 }
  0x1a   :  { %148 = vperm.xlu1 %429, %v19_v8  }
  0x1b   :  { %58 = vperm.xlu0 %435, %v20_v9  }
  0x1e   :  { %152 = vperm.xlu1 %429, %v20_v9  }
  0x1f   :  { %63 = vperm.xlu0 %435, %v21_v3  }
  0x22   :  { %430 = vset.pattern.permute.xlu1 %v447_v7 }
  0x23   :  { %78 = vperm.xlu0 %435, %v24_v11   ;;  %68 = vperm.xlu1 %430, %v22_v12  }
  0x27   :  { %83 = vperm.xlu0 %435, %v25_v5   ;;  %431 = vset.pattern.permute.xlu1 %v446_v0 }
  0x28   :  { %160 = vperm.xlu1 %431, %v22_v12  }
  0x2b   :  { %98 = vperm.xlu0 %435, %v28_v13  }
  0x2c   :  { %432 = vset.pattern.permute.xlu1 %v447_v7 }
  0x2d   :  { %73 = vperm.xlu1 %432, %v23_v14  }
  0x2f   :  { %103 = vperm.xlu0 %435, %v29_v15  }
  0x31   :  { %433 = vset.pattern.permute.xlu1 %v446_v0 }
  0x32   :  { %164 = vperm.xlu1 %433, %v23_v14  }
  0x33   :  { %440 = vset.pattern.permute.xlu0 %v446_v0 }
  0x34   :  { %188 = vperm.xlu0 %440, %v29_v15  }
  0x36   :  { %168 = vperm.xlu1 %433, %v24_v11  }
  0x3a   :  { %434 = vset.pattern.permute.xlu1 %v447_v7 }
  0x3b   :  { %88 = vperm.xlu1 %434, %v26_v16  }
  0x3f   :  { %436 = vset.pattern.permute.xlu1 %v446_v0 }
  0x40   :  { %176 = vperm.xlu1 %436, %v26_v16  }
  0x44   :  { %437 = vset.pattern.permute.xlu1 %v447_v7 }
  0x45   :  { %93 = vperm.xlu1 %437, %v27_v17  }
  0x49   :  { %438 = vset.pattern.permute.xlu1 %v446_v0 }
  0x4a   :  { %180 = vperm.xlu1 %438, %v27_v17  }
  0x4e   :  { %184 = vperm.xlu1 %438, %v28_v13  }
  0x52   :  { %439 = vset.pattern.permute.xlu1 %v447_v7 }
  0x53   :  { %108 = vperm.xlu1 %439, %v30_v18  }
  0x57   :  { %441 = vset.pattern.permute.xlu1 %v446_v0 }
  0x58   :  { %192 = vperm.xlu1 %441, %v30_v18  }
  0x81   :  { %v133_v21 = vpop.permute.xlu1 %132  ;;  %v141_v22 = vpop.permute.xlu0 %140 }
  0x82   :  { %v199_v36 = vmul.f32 %v535_v31, %v133_v21  ;;  %v201_v43 = vmul.f32 %v535_v31, %v141_v22 }
  0x85   :  { %v137_v24 = vpop.permute.xlu1 %136  ;;  %v157_v25 = vpop.permute.xlu0 %156 }
  0x86   :  { %v200_v38 = vmul.f32 %v535_v31, %v137_v24  ;;  %v205_v5 = vmul.f32 %v535_v31, %v157_v25 }
  0x89   :  { %v530_v27 = vpop.permute.xlu0 %172 }
  0x8a   :  { %v49_v30 = vpop.permute.xlu1 %48 }
  0x8b   :  { %v118_v44 = vmul.f32 %v537_v32, %v49_v30 }
  0x8e   :  { %v34_v33 = vpop.permute.xlu0 %33 }
  0x8f   :  { %v115_v34 = vmul.f32 %v537_v32, %v34_v33  ;;  %v145_v35 = vpop.permute.xlu1 %144 }
  0x90   :  { %v202_v40 = vmul.f32 %v535_v31, %v145_v35 }
  0x91   :  { %v215_v39 = vadd.f32 %v199_v36, %v115_v34  ;;  %v209_v34 = vmul.f32 %v535_v31, %v530_v27 }
  0x92   :  { %v39_v37 = vpop.permute.xlu0 %38  ;;  %v218_v48 = vadd.f32 %v202_v40, %v118_v44 }
  0x93   :  { %v116_v41 = vmul.f32 %v537_v32, %v39_v37  ;;  %v231_v47 = vmax.f32 %v215_v39, 0.0 }
  0x94   :  { %v54_v42 = vpop.permute.xlu1 %53  ;;  %v234_v55 = vmax.f32 %v218_v48, 0.0 }
  0x95   :  { %v216_v45 = vadd.f32 %v200_v38, %v116_v41  ;;  %v119_v58 = vmul.f32 %v537_v32, %v54_v42 }
  0x96   :  { %v44_v46 = vpop.permute.xlu0 %43 }
  0x97   :  { %v232_v49 = vmax.f32 %v216_v45, 0.0  ;;  %v117_v50 = vmul.f32 %v537_v32, %v44_v46 }
  0x99   :  { %v217_v51 = vadd.f32 %v201_v43, %v117_v50  ;;  %v149_v52 = vpop.permute.xlu1 %148  ;;  %v396_v53 = vpack.c.bf16 %v232_v49, %v231_v47 }
  0x9a   :  { %v203_v54 = vmul.f32 %v535_v31, %v149_v52  ;;  %v59_v57 = vpop.permute.xlu0 %58 }
  0x9b   :  { %v233_v56 = vmax.f32 %v217_v51, 0.0  ;;  %397 = vmatpush3.bf16.msra.mxu0 %v396_v53  ;;  %v120_v59 = vmul.f32 %v537_v32, %v59_v57 }
  0x9c   :  { %398 = vmatprep.subr.bf16.mxu0 %v448_v10  ;;  %v219_v62 = vadd.f32 %v203_v54, %v119_v58 }
  0x9d   :  { %v153_v60 = vpop.permute.xlu1 %152  ;;  %v399_v61 = vpack.c.bf16 %v234_v55, %v233_v56 }
  0x9e   :  { %v204_v63 = vmul.f32 %v535_v31, %v153_v60  ;;  %v235_v1 = vmax.f32 %v219_v62, 0.0  ;;  %v64_v4 = vpop.permute.xlu0 %63 }
  0x9f   :  { %400 = vmatpush3.bf16.msra.mxu0 %v399_v61  ;;  %v121_v6 = vmul.f32 %v537_v32, %v64_v4 }
  0xa0   :  { %v220_v0 = vadd.f32 %v204_v63, %v120_v59  ;;  %401 = vmatprep.subr.bf16.mxu0 %v448_v10 }
  0xa1   :  { %v221_v9 = vadd.f32 %v205_v5, %v121_v6  ;;  %v247_v6 = vld [vmem:[%s590_s2] sm:$0x3f] }
  0xa2   :  { %v236_v2 = vmax.f32 %v220_v0, 0.0  ;;  %v69_v3 = vpop.permute.xlu1 %68  ;;  %v79_v20 = vpop.permute.xlu0 %78 }
  0xa3   :  { %v122_v11 = vmul.f32 %v537_v32, %v69_v3  ;;  %v237_v14 = vmax.f32 %v221_v9, 0.0  ;;  %v124_v23 = vmul.f32 %v537_v32, %v79_v20 }
  0xa4   :  { %v402_v7 = vpack.c.bf16 %v236_v2, %v235_v1 }
  0xa6   :  { %403 = vmatpush3.bf16.msra.mxu0 %v402_v7  ;;  %v84_v28 = vpop.permute.xlu0 %83 }
  0xa7   :  { %v161_v8 = vpop.permute.xlu1 %160  ;;  %404 = vmatprep.subr.bf16.mxu0 %v448_v10  ;;  %v125_v35 = vmul.f32 %v537_v32, %v84_v28 }
  0xa8   :  { %v206_v12 = vmul.f32 %v535_v31, %v161_v8 }
  0xa9   :  { %v225_v38 = vadd.f32 %v209_v34, %v125_v35 }
  0xaa   :  { %v222_v13 = vadd.f32 %v206_v12, %v122_v11  ;;  %v99_v45 = vpop.permute.xlu0 %98 }
  0xab   :  { %v241_v42 = vmax.f32 %v225_v38, 0.0  ;;  %v128_v51 = vmul.f32 %v537_v32, %v99_v45 }
  0xac   :  { %v238_v15 = vmax.f32 %v222_v13, 0.0  ;;  %v74_v16 = vpop.permute.xlu1 %73 }
  0xad   :  { %v123_v21 = vmul.f32 %v537_v32, %v74_v16 }
  0xae   :  { %v405_v17 = vpack.c.bf16 %v238_v15, %v237_v14  ;;  %v104_v48 = vpop.permute.xlu0 %103 }
  0xaf   :  { %v129_v59 = vmul.f32 %v537_v32, %v104_v48 }
  0xb0   :  { %406 = vmatpush3.bf16.msra.mxu0 %v405_v17 }
  0xb1   :  { %v165_v18 = vpop.permute.xlu1 %164  ;;  %407 = vmatprep.subr.bf16.mxu0 %v448_v10 }
  0xb2   :  { %v207_v19 = vmul.f32 %v535_v31, %v165_v18 }
  0xb3   :  { %v189_v55 = vpop.permute.xlu0 %188 }
  0xb4   :  { %v223_v24 = vadd.f32 %v207_v19, %v123_v21  ;;  %v213_v60 = vmul.f32 %v535_v31, %v189_v55 }
  0xb5   :  { %v169_v22 = vpop.permute.xlu1 %168 }
  0xb6   :  { %v208_v25 = vmul.f32 %v535_v31, %v169_v22  ;;  %v239_v29 = vmax.f32 %v223_v24, 0.0  ;;  %v229_v63 = vadd.f32 %v213_v60, %v129_v59 }
  0xb8   :  { %v224_v26 = vadd.f32 %v208_v25, %v124_v23  ;;  %v245_v3 = vmax.f32 %v229_v63, 0.0 }
  0xba   :  { %v240_v30 = vmax.f32 %v224_v26, 0.0  ;;  %v89_v33 = vpop.permute.xlu1 %88 }
  0xbb   :  { %v126_v39 = vmul.f32 %v537_v32, %v89_v33 }
  0xbc   :  { %v408_v36 = vpack.c.bf16 %v240_v30, %v239_v29 }
  0xbe   :  { %409 = vmatpush3.bf16.msra.mxu0 %v408_v36 }
  0xbf   :  { %v177_v37 = vpop.permute.xlu1 %176  ;;  %410 = vmatprep.subr.bf16.mxu0 %v448_v10 }
  0xc0   :  { %v210_v40 = vmul.f32 %v535_v31, %v177_v37 }
  0xc2   :  { %v226_v41 = vadd.f32 %v210_v40, %v126_v39 }
  0xc4   :  { %v242_v43 = vmax.f32 %v226_v41, 0.0  ;;  %v94_v44 = vpop.permute.xlu1 %93 }
  0xc5   :  { %v127_v49 = vmul.f32 %v537_v32, %v94_v44 }
  0xc6   :  { %v411_v46 = vpack.c.bf16 %v242_v43, %v241_v42 }
  0xc8   :  { %412 = vmatpush3.bf16.msra.mxu0 %v411_v46 }
  0xc9   :  { %v181_v27 = vpop.permute.xlu1 %180  ;;  %413 = vmatprep.subr.bf16.mxu0 %v448_v10 }
  0xca   :  { %v211_v47 = vmul.f32 %v535_v31, %v181_v27 }
  0xcc   :  { %v227_v52 = vadd.f32 %v211_v47, %v127_v49 }
  0xcd   :  { %v185_v50 = vpop.permute.xlu1 %184 }
  0xce   :  { %v212_v53 = vmul.f32 %v535_v31, %v185_v50  ;;  %v243_v56 = vmax.f32 %v227_v52, 0.0 }
  0xd0   :  { %v228_v54 = vadd.f32 %v212_v53, %v128_v51 }
  0xd2   :  { %v244_v57 = vmax.f32 %v228_v54, 0.0  ;;  %v109_v58 = vpop.permute.xlu1 %108 }
  0xd3   :  { %v130_v0 = vmul.f32 %v537_v32, %v109_v58 }
  0xd4   :  { %v414_v61 = vpack.c.bf16 %v244_v57, %v243_v56 }
  0xd6   :  { %415 = vmatpush3.bf16.msra.mxu0 %v414_v61 }
  0xd7   :  { %v193_v62 = vpop.permute.xlu1 %192  ;;  %416 = vmatprep.subr.bf16.mxu0 %v448_v10 }
  0xd8   :  { %v214_v1 = vmul.f32 %v535_v31, %v193_v62 }
  0xda   :  { %v230_v2 = vadd.f32 %v214_v1, %v130_v0 }
  0xdc   :  { %v246_v4 = vmax.f32 %v230_v2, 0.0 }
  0xde   :  { %v417_v5 = vpack.c.bf16 %v246_v4, %v245_v3 }
  0xe0   :  { %418 = vmatpush3.bf16.msra.mxu0 %v417_v5 }
  0xe3   :  { %393 = vmatmul.mubr.f32.vlgmr.msra.gmra.mrb[0].mxu0 %v247_v6 }
 0x1b6   :  { %v314_v7 = vpop.f32.mrb[0].mxu0 }
 0x1b7   :  { %v319_v8 = vsel %vm318_vm1, %v314_v7, -inf  ;;  %v394_v10 = vpop.f32.mrb[1].mxu0 }
 0x1b8   :  { %v320_v9 = vrot.slane %v319_v8, 4 }
 0x1ba   :  { %v321_v11 = vmax.f32 %v319_v8, %v320_v9 }
 0x1bc   :  { %v322_v32 = vrot.slane %v321_v11, 2 }
 0x1be   :  { %v323_v12 = vmax.f32 %v321_v11, %v322_v32 }
 0x1c0   :  { %v324_v31 = vrot.slane %v323_v12, 1 }
 0x1c2   :  { %v325_v13 = vmax.f32 %v323_v12, %v324_v31 }
 0x1c4   :  { %v326_v14 = vsub.f32 %v314_v7, %v325_v13 }
 0x1c6   :  { %v327_v15 = vmul.f32 1.442695, %v326_v14 }
 0x1c8   :  { %442 = vpow2.f32 %v327_v15 }
 0x1d2   :  { %v443_v16 = vpop.eup %442 }
 0x1d3   :  { %v329_v17 = vsel %vm318_vm1, %v443_v16, 0.0 }
 0x1d4   :  { %v330_v18 = vrot.slane %v329_v17, 4 }
 0x1d6   :  { %v331_v19 = vadd.f32 %v330_v18, %v329_v17 }
 0x1d8   :  { %v332_v20 = vrot.slane %v331_v19, 2 }
 0x1da   :  { %v333_v21 = vadd.f32 %v332_v20, %v331_v19 }
 0x1dc   :  { %v334_v22 = vrot.slane %v333_v21, 1 }
 0x1de   :  { %v335_v23 = vadd.f32 %v334_v22, %v333_v21 }
 0x1e0   :  { %444 = vrcp.f32 %v335_v23 }
 0x1ea   :  { %v445_v24 = vpop.eup %444 }
 0x1eb   :  { %v337_v25 = vmul.f32 %v445_v24, %v443_v16 }
 0x1ed   :  { %338 = vst.msk [vmem:[%s591_s3] sm:$0x3f] %vm318_vm1, %v337_v25 }

</bundles_post_ra>
